<compile_context>
chip_gen: v7x
topology: tpu7x:2x2x1
jax: 0.10.0
libtpu: 0.0.40
codegen_flags: <defaults>
</compile_context>

<pallas_src>
import functools

import jax
import jax.numpy as jnp
from jax.experimental import pallas as pl
from jax.experimental.pallas import tpu as pltpu

_LANE = 128
_MASK_NEG = -1e30   # f32-only sentinel for padded vocab lanes


def _round_up(x, m):
    return (x + m - 1) // m * m


def pad_embedding_table(emb_table):
    """One-time (hoistable) pad of the (V, V) table to (Vp, Vp), f32.

    Padded vocab *columns* of real rows are set to -1e30 so the softmax mask
    is baked into the table (no per-step compare/select in the kernel).
    Padded *rows* (token ids that never occur) are zero.
    """
    V = emb_table.shape[0]
    Vp = _round_up(V, _LANE)
    emb_p = jnp.zeros((Vp, Vp), jnp.float32)
    if Vp > V:
        emb_p = emb_p.at[:V, V:].set(jnp.float32(_MASK_NEG))
    emb_p = emb_p.at[:V, :V].set(emb_table.astype(jnp.float32))
    return emb_p


def _logits_kernel(idx_ref, emb_ref, logits_ref):
    """Embedding gather only (targets=None path).

    idx_ref    : (tm, 1)   int32   token ids for this row block
    emb_ref    : (Vp, Vp)  float32 padded embedding table (resident)
    logits_ref : (tm, Vp)  float32 lane-dense logits block
    """
    tm = idx_ref.shape[0]
    vp = emb_ref.shape[1]
    ids = idx_ref[...]                                          # (tm, 1)
    lane = jax.lax.broadcasted_iota(jnp.int32, (tm, vp), 1)     # (tm, Vp)
    onehot = (lane == ids).astype(jnp.float32)                  # (tm, Vp)
    logits_ref[...] = jnp.dot(onehot, emb_ref[...],
                              preferred_element_type=jnp.float32,
                              precision=jax.lax.Precision.HIGHEST)


def _logits_loss_kernel(idx_ref, tgt_ref, emb_ref, logits_ref, loss_ref,
                        *, n_valid):
    """Embedding gather + fused cross-entropy partial sum for one row block.

    idx_ref    : (tm, 1)          int32   token ids
    tgt_ref    : (tm, 1)          int32   target ids
    emb_ref    : (Vp, Vp)         float32 padded table (vocab mask baked in)
    logits_ref : (tm, Vp)         float32 logits block (lane-dense)
    loss_ref   : (1, 1)           float32 per-block partial NLL sum
    """
    i = pl.program_id(0)
    tm = idx_ref.shape[0]
    vp = emb_ref.shape[1]

    ids = idx_ref[...]                                          # (tm, 1)
    tgts = tgt_ref[...]                                         # (tm, 1)
    lane = jax.lax.broadcasted_iota(jnp.int32, (tm, vp), 1)     # (tm, Vp)

    # Embedding lookup as an exact one-hot matmul on the MXU.
    onehot = (lane == ids).astype(jnp.float32)                  # (tm, Vp)
    logits = jnp.dot(onehot, emb_ref[...],
                     preferred_element_type=jnp.float32,
                     precision=jax.lax.Precision.HIGHEST)       # (tm, Vp)
    logits_ref[...] = logits

    # Max-shifted logsumexp; padded lanes carry -1e30 from the table pad,
    # so no in-kernel vocab mask is needed (exp underflows to 0).
    m = jnp.max(logits, axis=-1, keepdims=True)                 # (tm, 1)
    lse = jnp.log(jnp.sum(jnp.exp(logits - m), axis=-1, keepdims=True)) + m

    # Gather the target-class logit via one-hot reduce.
    tgt_onehot = (lane == tgts).astype(jnp.float32)             # (tm, Vp)
    tgt_logit = jnp.sum(logits * tgt_onehot, axis=-1, keepdims=True)

    # Mask rows that are only padding (global row index >= n_valid).
    row = jax.lax.broadcasted_iota(jnp.int32, (tm, 1), 0) + i * tm
    valid = (row < n_valid).astype(jnp.float32)
    rowloss = (lse - tgt_logit) * valid                         # (tm, 1)

    # Single partial-sum scalar per step (no lane-sparse vector stores).
    loss_ref[...] = jnp.sum(rowloss, axis=0, keepdims=True)     # (1, 1)


def bigram_forward(idx, emb_table, targets=None, *, block_rows=512,
                   emb_table_padded=None, return_padded=False):
    """Forward pass matching BigramLanguageModel.forward semantics.

    Returns (logits, loss):
      - targets is None:  logits (B, T, V), loss None
      - targets given:    logits (B*T, V), loss = scalar mean cross-entropy

    block_rows       : row tile per grid step (clamped down for tiny batches).
    emb_table_padded : optional pre-padded table from pad_embedding_table();
                       pass it to hoist the padding out of a training loop.
    return_padded    : if True, return the lane-padded (Np, Vp) f32 logits
                       buffer directly (callers that fuse the downstream
                       softmax/sampling avoid a second HBM round trip).
    """
    B, T = idx.shape
    V = emb_table.shape[0]
    N = B * T
    Vp = _round_up(V, _LANE)

    emb_p = (pad_embedding_table(emb_table)
             if emb_table_padded is None else emb_table_padded)

    # Adaptive row tile: never pad a tiny batch up to a full 512-row tile,
    # keep the tile a multiple of 8 (sublane).  For large N the 512 default
    # yields >= 2 row blocks, so the "parallel" grid axis can shard across
    # the two TensorCores on v7x.
    block_rows = max(8, min(block_rows, _round_up(N, 8)))
    Np = _round_up(N, block_rows)
    num_blocks = Np // block_rows

    idx_flat = idx.reshape(N).astype(jnp.int32)
    idx_p = jnp.zeros((Np, 1), jnp.int32).at[:N, 0].set(idx_flat)

    # Resident-table spec: at Vp = 128 the default double buffer is 128 KiB
    # (non-issue); for a large vocab, single-buffer the constant block and
    # raise the scoped VMEM limit.
    table_bytes = Vp * Vp * 4
    compiler_kwargs = dict(dimension_semantics=("parallel",))
    if 2 * table_bytes > (16 << 20):
        table_spec = pl.BlockSpec((Vp, Vp), lambda i: (0, 0),
                                  pipeline_mode=pl.Buffered(1))
        compiler_kwargs["vmem_limit_bytes"] = int(
            table_bytes + 4 * block_rows * Vp * 4 + (4 << 20))
    else:
        table_spec = pl.BlockSpec((Vp, Vp), lambda i: (0, 0))
    compiler_params = pltpu.CompilerParams(**compiler_kwargs)

    row_spec = pl.BlockSpec((block_rows, 1), lambda i: (i, 0))
    logits_spec = pl.BlockSpec((block_rows, Vp), lambda i: (i, 0))

    if targets is None:
        # Logits-only kernel: no target DMA, no CE math.
        logits_p = pl.pallas_call(
            _logits_kernel,
            out_shape=jax.ShapeDtypeStruct((Np, Vp), jnp.float32),
            grid_spec=pltpu.PrefetchScalarGridSpec(
                num_scalar_prefetch=0,
                grid=(num_blocks,),
                in_specs=[row_spec, table_spec],
                out_specs=logits_spec,
            ),
            compiler_params=compiler_params,
        )(idx_p, emb_p)
        if return_padded:
            return logits_p, None
        return logits_p[:N, :V].reshape(B, T, V), None

    tgt_flat = targets.reshape(N).astype(jnp.int32)
    tgt_p = jnp.zeros((Np, 1), jnp.int32).at[:N, 0].set(tgt_flat)

    kernel = functools.partial(_logits_loss_kernel, n_valid=N)
    logits_p, block_loss = pl.pallas_call(
        kernel,
        out_shape=(
            jax.ShapeDtypeStruct((Np, Vp), jnp.float32),
            jax.ShapeDtypeStruct((num_blocks, 1), jnp.float32),
        ),
        grid_spec=pltpu.PrefetchScalarGridSpec(
            num_scalar_prefetch=0,
            grid=(num_blocks,),
            in_specs=[row_spec, row_spec, table_spec],
            out_specs=[logits_spec,
                       pl.BlockSpec((1, 1), lambda i: (i, 0))],
        ),
        compiler_params=compiler_params,
    )(idx_p, tgt_p, emb_p)

    loss = jnp.sum(block_loss) / jnp.float32(N)   # padded rows contribute 0
    if return_padded:
        return logits_p, loss
    return logits_p[:N, :V], loss


if __name__ == "__main__":
    # Small shapes consistent with the module: char-level vocab, short seq.
    vocab_size = 65
    B, T = 2, 8

    key = jax.random.PRNGKey(0)
    k_emb, k_idx, k_tgt = jax.random.split(key, 3)

    # nn.Embedding default init is N(0, 1).
    emb_table = jax.random.normal(k_emb, (vocab_size, vocab_size),
                                  dtype=jnp.float32)
    idx = jax.random.randint(k_idx, (B, T), 0, vocab_size, dtype=jnp.int32)
    targets = jax.random.randint(k_tgt, (B, T), 0, vocab_size, dtype=jnp.int32)

    # With targets -> (B*T, V) logits + scalar mean CE loss.
    logits, loss = bigram_forward(idx, emb_table, targets)
    logits = jax.block_until_ready(logits)
    loss = jax.block_until_ready(loss)

    # targets=None path -> (B, T, V) logits, loss None (logits-only kernel).
    logits3, loss_none = bigram_forward(idx, emb_table, None)
    logits3 = jax.block_until_ready(logits3)
    assert loss_none is None
    assert logits3.shape == (B, T, vocab_size)
    assert logits.shape == (B * T, vocab_size)

    # Multi-block grid (2 row blocks) + hoisted pre-padded table.
    emb_pre = pad_embedding_table(emb_table)
    logits_mb, loss_mb = bigram_forward(idx, emb_table, targets,
                                        block_rows=8,
                                        emb_table_padded=emb_pre)
    logits_mb = jax.block_until_ready(logits_mb)
    loss_mb = jax.block_until_ready(loss_mb)

    # Pure-JAX reference check.
    ref_logits = emb_table[idx.reshape(-1)]                       # (B*T, V)
    ref_lse = jax.nn.logsumexp(ref_logits, axis=-1)
    ref_tgt = jnp.take_along_axis(
        ref_logits, targets.reshape(-1, 1), axis=-1)[:, 0]
    ref_loss = jnp.mean(ref_lse - ref_tgt)

    assert jnp.allclose(logits, ref_logits, atol=1e-5, rtol=1e-5)
    assert jnp.allclose(loss, ref_loss, atol=1e-5, rtol=1e-5)
    assert jnp.allclose(logits3.reshape(B * T, vocab_size), ref_logits,
                        atol=1e-5, rtol=1e-5)
    assert jnp.allclose(logits_mb, ref_logits, atol=1e-5, rtol=1e-5)
    assert jnp.allclose(loss_mb, ref_loss, atol=1e-5, rtol=1e-5)

    # TODO(synk): `generate()` uses torch.multinomial sampling in a Python loop;
    # sampling stays on the host / plain JAX and is not part of this kernel.
    print("KERNEL_OK")
</pallas_src>

<mosaic_0001>
module attributes {stable_mosaic.version = 11 : i64} {
  func.func @_logits_loss_kernel(%arg0: i32, %arg1: memref<16x1xi32, #tpu.memory_space<vmem>>, %arg2: memref<16x1xi32, #tpu.memory_space<vmem>>, %arg3: memref<128x128xf32, #tpu.memory_space<vmem>>, %arg4: memref<16x128xf32, #tpu.memory_space<vmem>>, %arg5: memref<1x1xf32, #tpu.memory_space<vmem>>) attributes {dimension_semantics = [#tpu.dimension_semantics<parallel>], iteration_bounds = array<i64: 1>, scalar_prefetch = 0 : i64, scratch_operands = 0 : i64, tpu.core_type = #tpu.core_type<tc>, window_params = [{transform_indices = @transform_0, window_bounds = array<i64: 16, 1>}, {transform_indices = @transform_1, window_bounds = array<i64: 16, 1>}, {pipeline_mode = #tpu.pipeline_mode<synchronous>, transform_indices = @transform_2, window_bounds = array<i64: 128, 128>}, {transform_indices = @transform_3, window_bounds = array<i64: 16, 128>}, {transform_indices = @transform_4, window_bounds = array<i64: 1, 1>}]} {
    %c0 = arith.constant 0 : index
    %c0_0 = arith.constant 0 : index
    %0 = vector.load %arg1[%c0, %c0_0] : memref<16x1xi32, #tpu.memory_space<vmem>>, vector<16x1xi32>
    %c0_1 = arith.constant 0 : index
    %c0_2 = arith.constant 0 : index
    %1 = vector.load %arg2[%c0_1, %c0_2] : memref<16x1xi32, #tpu.memory_space<vmem>>, vector<16x1xi32>
    %2 = tpu.iota {dimensions = array<i32: 1>} : vector<16x128xi32>
    %3 = vector.broadcast %0 : vector<16x1xi32> to vector<16x128xi32>
    %4 = arith.cmpi eq, %2, %3 : vector<16x128xi32>
    %5 = arith.extui %4 : vector<16x128xi1> to vector<16x128xi32>
    %6 = arith.sitofp %5 : vector<16x128xi32> to vector<16x128xf32>
    %c0_3 = arith.constant 0 : index
    %c0_4 = arith.constant 0 : index
    %7 = vector.load %arg3[%c0_3, %c0_4] : memref<128x128xf32, #tpu.memory_space<vmem>>, vector<128x128xf32>
    %cst = arith.constant dense<0.000000e+00> : vector<16x128xf32>
    %8 = tpu.matmul %6, %7, %cst {dimension_numbers = #tpu.dot_dimension_numbers<[1], [0], [0], [1], [0, 0, 1, 1], [], []>, precision = #tpu.contract_precision<fp32>} : vector<16x128xf32>, vector<128x128xf32>, vector<16x128xf32> -> vector<16x128xf32>
    %c0_5 = arith.constant 0 : index
    %c0_6 = arith.constant 0 : index
    %9 = vector.load %arg4[%c0_5, %c0_6] : memref<16x128xf32, #tpu.memory_space<vmem>>, vector<16x128xf32>
    tpu.vector_store %arg4[%c0_5, %c0_6], %8 {strides = array<i32>} : memref<16x128xf32, #tpu.memory_space<vmem>>, vector<16x128xf32>,
    %cst_7 = arith.constant dense<0xFF800000> : vector<16xf32>
    %10 = vector.multi_reduction <maximumf>, %8, %cst_7 [1] : vector<16x128xf32> to vector<16xf32>
    %11 = vector.shape_cast %10 : vector<16xf32> to vector<16x1xf32>
    %12 = vector.broadcast %11 : vector<16x1xf32> to vector<16x128xf32>
    %13 = arith.subf %8, %12 : vector<16x128xf32>
    %14 = math.exp %13 : vector<16x128xf32>
    %cst_8 = arith.constant dense<0.000000e+00> : vector<16xf32>
    %15 = vector.multi_reduction <add>, %14, %cst_8 [1] : vector<16x128xf32> to vector<16xf32>
    %16 = vector.shape_cast %15 : vector<16xf32> to vector<16x1xf32>
    %17 = math.log %16 : vector<16x1xf32>
    %18 = arith.addf %17, %11 : vector<16x1xf32>
    %19 = vector.broadcast %1 : vector<16x1xi32> to vector<16x128xi32>
    %20 = arith.cmpi eq, %2, %19 : vector<16x128xi32>
    %21 = arith.extui %20 : vector<16x128xi1> to vector<16x128xi32>
    %22 = arith.sitofp %21 : vector<16x128xi32> to vector<16x128xf32>
    %23 = arith.mulf %8, %22 : vector<16x128xf32>
    %cst_9 = arith.constant dense<0.000000e+00> : vector<16xf32>
    %24 = vector.multi_reduction <add>, %23, %cst_9 [1] : vector<16x128xf32> to vector<16xf32>
    %25 = vector.shape_cast %24 : vector<16xf32> to vector<16x1xf32>
    %26 = tpu.iota {dimensions = array<i32: 0>} : vector<16x1xi32>
    %c16_i32 = arith.constant 16 : i32
    %27 = arith.muli %arg0, %c16_i32 : i32
    %28 = vector.broadcast %27 : i32 to vector<16x1xi32>
    %29 = arith.addi %26, %28 : vector<16x1xi32>
    %c16_i32_10 = arith.constant 16 : i32
    %30 = vector.broadcast %c16_i32_10 : i32 to vector<16x1xi32>
    %31 = arith.cmpi slt, %29, %30 : vector<16x1xi32>
    %32 = arith.extui %31 : vector<16x1xi1> to vector<16x1xi32>
    %33 = arith.sitofp %32 : vector<16x1xi32> to vector<16x1xf32>
    %34 = arith.subf %18, %25 : vector<16x1xf32>
    %35 = arith.mulf %34, %33 : vector<16x1xf32>
    %cst_11 = arith.constant dense<0.000000e+00> : vector<1xf32>
    %36 = vector.multi_reduction <add>, %35, %cst_11 [0] : vector<16x1xf32> to vector<1xf32>
    %37 = vector.shape_cast %36 : vector<1xf32> to vector<1x1xf32>
    %c0_12 = arith.constant 0 : index
    %c0_13 = arith.constant 0 : index
    %38 = vector.load %arg5[%c0_12, %c0_13] : memref<1x1xf32, #tpu.memory_space<vmem>>, vector<1x1xf32>
    tpu.vector_store %arg5[%c0_12, %c0_13], %37 {strides = array<i32>} : memref<1x1xf32, #tpu.memory_space<vmem>>, vector<1x1xf32>,
    return
  }
  func.func @transform_0(%arg0: i32) -> (i32, i32) {
    %c0_i32 = arith.constant 0 : i32
    %c0_i32_0 = arith.constant 0 : i32
    return %arg0, %c0_i32 : i32, i32
  }
  func.func @transform_1(%arg0: i32) -> (i32, i32) {
    %c0_i32 = arith.constant 0 : i32
    %c0_i32_0 = arith.constant 0 : i32
    return %arg0, %c0_i32 : i32, i32
  }
  func.func @transform_2(%arg0: i32) -> (i32, i32) {
    %c0_i32 = arith.constant 0 : i32
    %c0_i32_0 = arith.constant 0 : i32
    %c0_i32_1 = arith.constant 0 : i32
    return %c0_i32, %c0_i32_0 : i32, i32
  }
  func.func @transform_3(%arg0: i32) -> (i32, i32) {
    %c0_i32 = arith.constant 0 : i32
    %c0_i32_0 = arith.constant 0 : i32
    return %arg0, %c0_i32 : i32, i32
  }
  func.func @transform_4(%arg0: i32) -> (i32, i32) {
    %c0_i32 = arith.constant 0 : i32
    %c0_i32_0 = arith.constant 0 : i32
    return %arg0, %c0_i32 : i32, i32
  }
}

</mosaic_0001>

<bundles_post_ra>
// kernel: tpu_custom_call.1
= control target key start
LH: loop header
LB: loop body
LE: loop exit
PB: predicated region body
PF: predicated region fallthrough
CT: control target
= control target key end

     0   :  { %10 = vsyncpa [#allocation3], 0  ;;  %s1816_s0 = inlined_call_operand.vmem [shape: s32[16,1], index: 0, kind: input, shape index: {}]   ;;  %s1817_s1 = inlined_call_operand.vmem [shape: s32[16,1], index: 1, kind: input, shape index: {}]   ;;  %s1818_s2 = inlined_call_operand.hbm [shape: f32[128,128], index: 2, kind: input, shape index: {}]   ;;  %s1819_s3 = inlined_call_operand.hbm [shape: f32[16,128], index: 3, kind: output, shape index: {0}]   ;;  %s1820_s4 = inlined_call_operand.hbm [shape: f32[1,1], index: 4, kind: output, shape index: {1}]  }
   0x1   :  { %11 = vsyncpa [#allocation4], 0 }
   0x2   :  { %12 = vsyncpa [#allocation7], 0  ;;  %s1467_s15 = smov [#allocation2]   ;;  %s1395_s19 = scalar_lea.hbm %s1818_s2, 2048 }
   0x3   :  { %s22_s16 = sshll.u32 %s1467_s15, 4  ;;  %p1396_p0 = scmp.ne.s32.totalorder %s1818_s2, %s1395_s19  ;;  %s23_s16 = int_to_ptr.vmem [resolvable:$true] %s22_s16 }
   0x4   :  { %p1399_p1 = scmp.lt.u32.totalorder %s1395_s19, %s1818_s2 }
   0x6   :  { %p1401_p2 = pnand %p1399_p1, %p1396_p0 }
   0x8   :  { %1404 = shalt.err (!%p1401_p2)
}
   0x9   :  { %s1405_s24 = scalar_lea.vmem %s23_s16, 2048  ;;  %p1410_p4 = scmp.lt.s32.totalorder %s23_s16, %s23_s16 }
   0xa   :  { %p1406_p3 = scmp.ne.s32.totalorder %s23_s16, %s1405_s24  ;;  %p1411_p5 = scmp.lt.s32.totalorder %s1405_s24, %s1405_s24 }
   0xc   :  { %p1412_p6 = por %p1411_p5, %p1410_p4 }
   0xe   :  { %p1413_p7 = pnand %p1412_p6, %p1406_p3 }
  0x10   :  { %1416 = shalt.err (!%p1413_p7)
}
  0x11   :  { %s1468_s25 = smov 128   ;;  %s1469_s26 = smov 8  }
  0x12   :  { %28 = dma.hbm_to_vmem [thread:$0]  %s1818_s2, 2048, %s23_s16, [#allocation3], %s1468_s25, %s1468_s25, %s1469_s26  }
  0x13   :  { %1461 = dma.done.wait [#allocation3], 2048  }
  0x14   :  { %1462 = vsyncadd [#allocation3], 4294965248  ;;  %v1470_v0 = vmov 0   ;;  %v32_v1 = vld [vmem:[%s1816_s0] sm:$0xff]  ;;  %v33_v2 = vld [vmem:[%s1816_s0 + $0x8] sm:$0xff] }
  0x15   :  { %1385 = vset.pattern.permute.xlu0 %v1470_v0  ;;  %1386 = vset.pattern.permute.xlu1 %v1470_v0  ;;  %v50_v3 = vld [vmem:[#allocation2] sm:$0xff]  ;;  %v51_v4 = vld [vmem:[#allocation2 + $0x8] sm:$0xff]  ;;  %v52_v5 = vld [vmem:[#allocation2 + $0x10] sm:$0xff] }
  0x16   :  { %39 = vperm.xlu0 %1385, %v32_v1   ;;  %v67_v6 = vand.u32 4294901760, %v50_v3  ;;  %v70_v7 = vand.u32 4294901760, %v51_v4  ;;  %v53_v8 = vld [vmem:[#allocation2 + $0x18] sm:$0xff]  ;;  %v73_v9 = vand.u32 4294901760, %v52_v5  ;;  %v54_v10 = vld [vmem:[#allocation2 + $0x20] sm:$0xff]  ;;  %v55_v11 = vld [vmem:[#allocation2 + $0x28] sm:$0xff] }
  0x17   :  { %v76_v12 = vand.u32 4294901760, %v53_v8  ;;  %v79_v14 = vand.u32 4294901760, %v54_v10  ;;  %v82_v15 = vand.u32 4294901760, %v55_v11  ;;  %v56_v17 = vld [vmem:[#allocation2 + $0x30] sm:$0xff]  ;;  %v57_v18 = vld [vmem:[#allocation2 + $0x38] sm:$0xff]  ;;  %v34_v19 = vld [vmem:[%s1817_s1] sm:$0xff] }
  0x18   :  { %v1521_v13 = vpack.c.bf16 %v70_v7, %v67_v6  ;;  %v85_v21 = vand.u32 4294901760, %v56_v17  ;;  %v88_v22 = vand.u32 4294901760, %v57_v18  ;;  %v58_v23 = vld [vmem:[#allocation2 + $0x40] sm:$0xff]  ;;  %v59_v24 = vld [vmem:[#allocation2 + $0x48] sm:$0xff]  ;;  %v1536_v25 = vsub.f32 %v52_v5, %v73_v9  ;;  %v1542_v29 = vld [vmem:[#allocation2 + $0x50] sm:$0xff] }
  0x19   :  { %v1523_v16 = vpack.c.bf16 %v76_v12, %v73_v9  ;;  %v1534_v20 = vpack.c.bf16 %v82_v15, %v79_v14  ;;  %v1538_v26 = vsub.f32 %v53_v8, %v76_v12  ;;  %v91_v27 = vand.u32 4294901760, %v58_v23  ;;  %v1550_v33 = vld [vmem:[#allocation2 + $0x58] sm:$0xff]  ;;  %v1566_v42 = vld [vmem:[#allocation2 + $0x60] sm:$0xff]  ;;  %v1570_v45 = vld [vmem:[#allocation2 + $0x68] sm:$0xff] }
  0x1a   :  { %42 = vperm.xlu0 %1385, %v33_v2   ;;  %1272 = vmatprep.subr.bf16.mxu0 %v1521_v13  ;;  %v94_v28 = vand.u32 4294901760, %v59_v24  ;;  %v184_v30 = vand.u32 4294901760, %v1536_v25  ;;  %v1548_v32 = vpack.c.bf16 %v88_v22, %v85_v21  ;;  %v97_v37 = vand.u32 4294901760, %v1542_v29  ;;  %v1594_v59 = vld [vmem:[#allocation2 + $0x70] sm:$0xff]  ;;  %v65_v62 = vld [vmem:[#allocation2 + $0x78] sm:$0xff] }
  0x1b   :  { %1176 = vmatprep.subr.bf16.mxu1 %v1521_v13  ;;  %1274 = vmatpush3.bf16.msra.mxu0 %v1521_v13  ;;  %v191_v31 = vand.u32 4294901760, %v1538_v26  ;;  %v1557_v38 = vsub.f32 %v54_v10, %v79_v14  ;;  %v1559_v39 = vsub.f32 %v55_v11, %v82_v15  ;;  %v100_v41 = vand.u32 4294901760, %v1550_v33 }
  0x1c   :  { %1178 = vmatpush3.bf16.msra.mxu1 %v1521_v13  ;;  %1276 = vmatprep.subr.bf16.mxu0 %v1523_v16  ;;  %v185_v35 = vsub.f32 %v1536_v25, %v184_v30  ;;  %v1563_v40 = vpack.c.bf16 %v94_v28, %v91_v27  ;;  %v1572_v46 = vsub.f32 %v50_v3, %v67_v6  ;;  %v103_v53 = vand.u32 4294901760, %v1566_v42 }
  0x1d   :  { %1180 = vmatprep.subr.bf16.mxu1 %v1523_v16  ;;  %v1552_v34 = vpack.c.bf16 %v191_v31, %v184_v30  ;;  %v192_v36 = vsub.f32 %v1538_v26, %v191_v31  ;;  %v1574_v47 = vsub.f32 %v51_v4, %v70_v7  ;;  %v198_v48 = vand.u32 4294901760, %v1557_v38 }
  0x1e   :  { %773 = vperm.xlu0 %1385, %v34_v19   ;;  %v186_v43 = vand.u32 4294901760, %v185_v35  ;;  %v205_v49 = vand.u32 4294901760, %v1559_v39  ;;  %v1580_v51 = vsub.f32 %v56_v17, %v85_v21  ;;  %v1582_v52 = vsub.f32 %v57_v18, %v88_v22 }
  0x1f   :  { %1278 = vmatpush3.bf16.msra.mxu0 %v1523_v16  ;;  %v193_v44 = vand.u32 4294901760, %v192_v36  ;;  %v199_v55 = vsub.f32 %v1557_v38, %v198_v48  ;;  %v1591_v57 = vpack.c.bf16 %v100_v41, %v97_v37  ;;  %v106_v58 = vand.u32 4294901760, %v1570_v45 }
  0x20   :  { %1182 = vmatpush3.bf16.msra.mxu1 %v1523_v16  ;;  %1280 = vmatprep.subr.bf16.mxu0 %v1534_v20  ;;  %v1585_v54 = vpack.c.bf16 %v205_v49, %v198_v48  ;;  %v206_v56 = vsub.f32 %v1559_v39, %v205_v49  ;;  %v212_v60 = vand.u32 4294901760, %v1580_v51  ;;  %v219_v61 = vand.u32 4294901760, %v1582_v52 }
  0x21   :  { %1184 = vmatprep.subr.bf16.mxu1 %v1534_v20  ;;  %v1578_v50 = vpack.c.bf16 %v193_v44, %v186_v43  ;;  %v170_v63 = vand.u32 4294901760, %v1572_v46  ;;  %v177_v0 = vand.u32 4294901760, %v1574_v47  ;;  %v200_v1 = vand.u32 4294901760, %v199_v55 }
  0x22   :  { %v207_v2 = vand.u32 4294901760, %v206_v56  ;;  %v1602_v3 = vpack.c.bf16 %v219_v61, %v212_v60  ;;  %v213_v4 = vsub.f32 %v1580_v51, %v212_v60  ;;  %v220_v5 = vsub.f32 %v1582_v52, %v219_v61 }
  0x23   :  { %1282 = vmatpush3.bf16.msra.mxu0 %v1534_v20  ;;  %v1606_v6 = vsub.f32 %v58_v23, %v91_v27  ;;  %v109_v7 = vand.u32 4294901760, %v1594_v59  ;;  %v1611_v9 = vsub.f32 %v59_v24, %v94_v28  ;;  %v112_v10 = vand.u32 4294901760, %v65_v62 }
  0x24   :  { %1186 = vmatpush3.bf16.msra.mxu1 %v1534_v20  ;;  %1284 = vmatprep.subr.bf16.mxu0 %v1548_v32  ;;  %v1609_v8 = vpack.c.bf16 %v207_v2, %v200_v1  ;;  %v214_v11 = vand.u32 4294901760, %v213_v4  ;;  %v221_v12 = vand.u32 4294901760, %v220_v5  ;;  %v1618_v15 = vpack.c.bf16 %v106_v58, %v103_v53 }
  0x25   :  { %1188 = vmatprep.subr.bf16.mxu1 %v1548_v32  ;;  %v226_v14 = vand.u32 4294901760, %v1606_v6  ;;  %v171_v17 = vsub.f32 %v1572_v46, %v170_v63  ;;  %v178_v18 = vsub.f32 %v1574_v47, %v177_v0  ;;  %v233_v19 = vand.u32 4294901760, %v1611_v9 }
  0x26   :  { %v1623_v21 = vpack.c.bf16 %v221_v12, %v214_v11  ;;  %v239_v23 = vsub.f32 %v1542_v29, %v97_v37  ;;  %v246_v24 = vsub.f32 %v1550_v33, %v100_v41  ;;  %v1635_v36 = vpack.c.bf16 %v112_v10, %v109_v7 }
  0x27   :  { %1286 = vmatpush3.bf16.msra.mxu0 %v1548_v32  ;;  %v227_v22 = vsub.f32 %v1606_v6, %v226_v14  ;;  %v1628_v27 = vpack.c.bf16 %v233_v19, %v226_v14  ;;  %v234_v28 = vsub.f32 %v1611_v9, %v233_v19  ;;  %v172_v29 = vand.u32 4294901760, %v171_v17 }
  0x28   :  { %1190 = vmatpush3.bf16.msra.mxu1 %v1548_v32  ;;  %1288 = vmatprep.subr.bf16.mxu0 %v1563_v40  ;;  %v240_v31 = vand.u32 4294901760, %v239_v23  ;;  %v247_v35 = vand.u32 4294901760, %v246_v24  ;;  %v179_v37 = vand.u32 4294901760, %v178_v18  ;;  %v253_v48 = vsub.f32 %v1566_v42, %v103_v53 }
  0x29   :  { %1192 = vmatprep.subr.bf16.mxu1 %v1563_v40  ;;  %v228_v30 = vand.u32 4294901760, %v227_v22  ;;  %v235_v33 = vand.u32 4294901760, %v234_v28  ;;  %v260_v55 = vsub.f32 %v1570_v45, %v106_v58  ;;  %v1303_v1 = vpack.c.bf16 %v177_v0, %v170_v63 }
  0x2a   :  { %v1637_v41 = vpack.c.bf16 %v247_v35, %v240_v31  ;;  %v241_v43 = vsub.f32 %v239_v23, %v240_v31  ;;  %v248_v44 = vsub.f32 %v246_v24, %v247_v35  ;;  %v254_v61 = vand.u32 4294901760, %v253_v48 }
  0x2b   :  { %1290 = vmatpush3.bf16.msra.mxu0 %v1563_v40  ;;  %v1640_v49 = vpack.c.bf16 %v235_v33, %v228_v30  ;;  %v1207_v2 = vpack.c.bf16 %v179_v37, %v172_v29  ;;  %v261_v4 = vand.u32 4294901760, %v260_v55  ;;  %v267_v53 = vsub.f32 %v1594_v59, %v109_v7 }
  0x2c   :  { %1194 = vmatpush3.bf16.msra.mxu1 %v1563_v40  ;;  %1292 = vmatprep.subr.bf16.mxu0 %v1591_v57  ;;  %v242_v56 = vand.u32 4294901760, %v241_v43  ;;  %v249_v60 = vand.u32 4294901760, %v248_v44  ;;  %v255_v42 = vsub.f32 %v253_v48, %v254_v61  ;;  %v274_v45 = vsub.f32 %v65_v62, %v112_v10 }
  0x2d   :  { %1196 = vmatprep.subr.bf16.mxu1 %v1591_v57  ;;  %v1650_v58 = vpack.c.bf16 %v261_v4, %v254_v61  ;;  %v262_v11 = vsub.f32 %v260_v55, %v261_v4  ;;  %v268_v14 = vand.u32 4294901760, %v267_v53  ;;  %v1660_v10 = vpack.c.bf16 %v1574_v47, %v1572_v46 }
  0x2e   :  { %v1647_v5 = vpack.c.bf16 %v249_v60, %v242_v56  ;;  %v256_v12 = vand.u32 4294901760, %v255_v42  ;;  %v275_v17 = vand.u32 4294901760, %v274_v45  ;;  %v1664_v28 = vpack.c.bf16 %v1538_v26, %v1536_v25 }
  0x2f   :  { %1294 = vmatpush3.bf16.msra.mxu0 %v1591_v57  ;;  %v263_v63 = vand.u32 4294901760, %v262_v11  ;;  %v269_v18 = vsub.f32 %v267_v53, %v268_v14  ;;  %v1668_v30 = vpack.c.bf16 %v1559_v39, %v1557_v38  ;;  %v1672_v31 = vpack.c.bf16 %v1582_v52, %v1580_v51 }
  0x30   :  { %1198 = vmatpush3.bf16.msra.mxu1 %v1591_v57  ;;  %1296 = vmatprep.subr.bf16.mxu0 %v1618_v15  ;;  %v1654_v0 = vpack.c.bf16 %v275_v17, %v268_v14  ;;  %v276_v19 = vsub.f32 %v274_v45, %v275_v17  ;;  %v1676_v35 = vpack.c.bf16 %v1611_v9, %v1606_v6  ;;  %v36_v25 = vlaneseq }
  0x31   :  { %1200 = vmatprep.subr.bf16.mxu1 %v1618_v15  ;;  %v1231_v22 = vpack.c.bf16 %v263_v63, %v256_v12  ;;  %v270_v59 = vand.u32 4294901760, %v269_v18  ;;  %v1678_v29 = vpack.c.bf16 %v246_v24, %v239_v23  ;;  %v1680_v46 = vpack.c.bf16 %v260_v55, %v253_v48 }
  0x32   :  { %v277_v62 = vand.u32 4294901760, %v276_v19  ;;  %v1682_v47 = vpack.c.bf16 %v274_v45, %v267_v53  ;;  %v1684_v26 = vand.u32 127, %v36_v25  ;;  %v1471_v38 = vmov 0.0  }
  0x33   :  { %1298 = vmatpush3.bf16.msra.mxu0 %v1618_v15  ;;  %v1472_v48 = vmov 1.0  }
  0x34   :  { %1202 = vmatpush3.bf16.msra.mxu1 %v1618_v15  ;;  %1300 = vmatprep.subr.bf16.mxu0 %v1635_v36  ;;  %v1656_v7 = vpack.c.bf16 %v277_v62, %v270_v59 }
  0x35   :  { %1204 = vmatprep.subr.bf16.mxu1 %v1635_v36 }
  0x37   :  { %1302 = vmatpush3.bf16.msra.mxu0 %v1635_v36 }
  0x38   :  { %1206 = vmatpush3.bf16.msra.mxu1 %v1635_v36  ;;  %1304 = vmatprep.subr.bf16.mxu0 %v1303_v1 }
  0x39   :  { %1208 = vmatprep.subr.bf16.mxu1 %v1207_v2 }
  0x95   :  { %v40_v37 = vpop.permute.xlu0 %39 }
  0x96   :  { %vm44_vm0 = vcmp.eq.s32.totalorder %v1684_v26, %v40_v37 }
  0x97   :  { %v847_v39 = vsel %vm44_vm0, 1.0, %v1471_v38 }
  0x98   :  { %v148_v51 = vsub.f32 %v847_v39, %v847_v39 }
  0x99   :  { %v1690_v52 = vpop.permute.xlu0 %42 }
  0x9a   :  { %vm45_vm1 = vcmp.eq.s32.totalorder %v1684_v26, %v1690_v52  ;;  %v149_v6 = vand.u32 4294901760, %v148_v51 }
  0x9b   :  { %v848_v9 = vsel %vm45_vm1, 1.0, %v1471_v38 }
  0x9c   :  { %v1698_v23 = vsub.f32 %v848_v9, %v848_v9  ;;  %1102 = vmatprep.mubr.f32.mxu0 %v149_v6  ;;  %v150_v24 = vsub.f32 %v148_v51, %v149_v6 }
  0x9e   :  { %v151_v33 = vand.u32 4294901760, %v150_v24  ;;  %v159_v43 = vand.u32 4294901760, %v1698_v23 }
  0xa0   :  { %997 = vmatprep.mubr.f32.mxu1 %v151_v33  ;;  %1103 = vmatmul.mubr.f32.vlgmr.msra.gmra.mrb[0].mxu0 %v159_v43  ;;  %v160_v44 = vsub.f32 %v1698_v23, %v159_v43 }
  0xa1   :  { %1306 = vmatpush3.bf16.msra.mxu0 %v1303_v1  ;;  %1137 = vmatprep.mubr.msk.f32.mxu0 %vm44_vm0, %v1472_v48 }
  0xa2   :  { %1308 = vmatprep.subr.bf16.mxu0 %v1552_v34  ;;  %v161_v55 = vand.u32 4294901760, %v160_v44 }
  0xa4   :  { %998 = vmatmul.mubr.f32.vlgmr.msra.gmra.mrb[0].mxu1 %v161_v55 }
  0xa5   :  { %1210 = vmatpush3.bf16.msra.mxu1 %v1207_v2  ;;  %1310 = vmatpush3.bf16.msra.mxu0 %v1552_v34 }
  0xa6   :  { %1032 = vmatprep.mubr.msk.f32.mxu1 %vm44_vm0, %v1472_v48  ;;  %1212 = vmatprep.subr.bf16.mxu1 %v1578_v50 }
  0xa7   :  { %1312 = vmatprep.subr.bf16.mxu0 %v1585_v54 }
  0xa9   :  { %1214 = vmatpush3.bf16.msra.mxu1 %v1578_v50  ;;  %1314 = vmatpush3.bf16.msra.mxu0 %v1585_v54  ;;  %v35_v50 = vld [vmem:[%s1817_s1 + $0x8] sm:$0xff]  ;;  %s1473_s1 = smov [#allocation5]  }
  0xaa   :  { %1216 = vmatprep.subr.bf16.mxu1 %v1609_v8  ;;  %1316 = vmatprep.subr.bf16.mxu0 %v1602_v3  ;;  %s821_s9 = sshll.u32 %s1473_s1, 4  ;;  %s822_s9 = int_to_ptr.vmem [resolvable:$true] %s821_s9 }
  0xab   :  { %s1417_s10 = scalar_lea.vmem %s822_s9, 256  ;;  %p1422_p9 = scmp.lt.s32.totalorder %s822_s9, %s822_s9 }
  0xac   :  { %p1418_p8 = scmp.ne.s32.totalorder %s822_s9, %s1417_s10  ;;  %p1423_p10 = scmp.lt.s32.totalorder %s1417_s10, %s1417_s10 }
  0xad   :  { %1218 = vmatpush3.bf16.msra.mxu1 %v1609_v8  ;;  %1318 = vmatpush3.bf16.msra.mxu0 %v1602_v3 }
  0xae   :  { %1220 = vmatprep.subr.bf16.mxu1 %v1623_v21  ;;  %1320 = vmatprep.subr.bf16.mxu0 %v1628_v27  ;;  %p1424_p11 = por %p1423_p10, %p1422_p9 }
  0xb0   :  { %p1425_p12 = pnand %p1424_p11, %p1418_p8 }
  0xb1   :  { %1222 = vmatpush3.bf16.msra.mxu1 %v1623_v21  ;;  %1322 = vmatpush3.bf16.msra.mxu0 %v1628_v27 }
  0xb2   :  { %1224 = vmatprep.subr.bf16.mxu1 %v1640_v49  ;;  %1324 = vmatprep.subr.bf16.mxu0 %v1637_v41 }
  0xb5   :  { %1226 = vmatpush3.bf16.msra.mxu1 %v1640_v49  ;;  %1326 = vmatpush3.bf16.msra.mxu0 %v1637_v41 }
  0xb6   :  { %1228 = vmatprep.subr.bf16.mxu1 %v1647_v5  ;;  %1328 = vmatprep.subr.bf16.mxu0 %v1650_v58 }
  0xb9   :  { %1230 = vmatpush3.bf16.msra.mxu1 %v1647_v5  ;;  %1330 = vmatpush3.bf16.msra.mxu0 %v1650_v58 }
  0xba   :  { %1232 = vmatprep.subr.bf16.mxu1 %v1231_v22  ;;  %1332 = vmatprep.subr.bf16.mxu0 %v1654_v0 }
  0xbd   :  { %1234 = vmatpush3.bf16.msra.mxu1 %v1231_v22  ;;  %1334 = vmatpush3.bf16.msra.mxu0 %v1654_v0 }
  0xbe   :  { %1236 = vmatprep.subr.bf16.mxu1 %v1656_v7  ;;  %1336 = vmatprep.subr.bf16.mxu0 %v1521_v13 }
  0xc0   :  { %1138 = vmatmul.mubr.msk.f32.vlgmr.msra.gmra.mrb[0].mxu0 %vm45_vm1, %v1472_v48 }
  0xc1   :  { %1238 = vmatpush3.bf16.msra.mxu1 %v1656_v7  ;;  %1338 = vmatpush3.bf16.msra.mxu0 %v1521_v13 }
  0xc2   :  { %1172 = vmatprep.mubr.msk.f32.mxu0 %vm44_vm0, %v1472_v48  ;;  %1240 = vmatprep.subr.bf16.mxu1 %v1660_v10 }
  0xc3   :  { %1340 = vmatprep.subr.bf16.mxu0 %v1523_v16 }
  0xc4   :  { %1033 = vmatmul.mubr.msk.f32.vlgmr.msra.gmra.mrb[0].mxu1 %vm45_vm1, %v1472_v48 }
  0xc5   :  { %1242 = vmatpush3.bf16.msra.mxu1 %v1660_v10  ;;  %1067 = vmatprep.mubr.f32.mxu1 %v148_v51 }
  0xc6   :  { %1342 = vmatpush3.bf16.msra.mxu0 %v1523_v16  ;;  %1244 = vmatprep.subr.bf16.mxu1 %v1664_v28 }
  0xc7   :  { %1344 = vmatprep.subr.bf16.mxu0 %v1534_v20 }
  0xc9   :  { %1246 = vmatpush3.bf16.msra.mxu1 %v1664_v28 }
  0xca   :  { %1346 = vmatpush3.bf16.msra.mxu0 %v1534_v20  ;;  %1248 = vmatprep.subr.bf16.mxu1 %v1668_v30 }
  0xcb   :  { %1348 = vmatprep.subr.bf16.mxu0 %v1548_v32 }
  0xcd   :  { %1250 = vmatpush3.bf16.msra.mxu1 %v1668_v30 }
  0xce   :  { %1350 = vmatpush3.bf16.msra.mxu0 %v1548_v32  ;;  %1252 = vmatprep.subr.bf16.mxu1 %v1672_v31 }
  0xcf   :  { %1352 = vmatprep.subr.bf16.mxu0 %v1563_v40 }
  0xd1   :  { %1254 = vmatpush3.bf16.msra.mxu1 %v1672_v31 }
  0xd2   :  { %1354 = vmatpush3.bf16.msra.mxu0 %v1563_v40  ;;  %1256 = vmatprep.subr.bf16.mxu1 %v1676_v35 }
  0xd3   :  { %1356 = vmatprep.subr.bf16.mxu0 %v1591_v57 }
  0xd5   :  { %1258 = vmatpush3.bf16.msra.mxu1 %v1676_v35 }
  0xd6   :  { %1358 = vmatpush3.bf16.msra.mxu0 %v1591_v57  ;;  %1260 = vmatprep.subr.bf16.mxu1 %v1678_v29 }
  0xd7   :  { %1360 = vmatprep.subr.bf16.mxu0 %v1618_v15 }
  0xd9   :  { %1262 = vmatpush3.bf16.msra.mxu1 %v1678_v29 }
  0xda   :  { %1362 = vmatpush3.bf16.msra.mxu0 %v1618_v15  ;;  %1264 = vmatprep.subr.bf16.mxu1 %v1680_v46 }
  0xdb   :  { %1364 = vmatprep.subr.bf16.mxu0 %v1635_v36 }
  0xdd   :  { %1266 = vmatpush3.bf16.msra.mxu1 %v1680_v46 }
  0xde   :  { %1366 = vmatpush3.bf16.msra.mxu0 %v1635_v36  ;;  %1268 = vmatprep.subr.bf16.mxu1 %v1682_v47  ;;  %v774_v36 = vpop.permute.xlu0 %773 }
  0xdf   :  { %vm778_vm2 = vcmp.eq.s32.totalorder %v1684_v26, %v774_v36 }
  0xe0   :  { %v855_v56 = vsel %vm778_vm2, 1.0, %v1471_v38 }
  0xe1   :  { %1173 = vmatmul.mubr.msk.f32.vlgmr.msra.gmra.mrb[0].mxu0 %vm45_vm1, %v1472_v48  ;;  %1270 = vmatpush3.bf16.msra.mxu1 %v1682_v47 }
  0xe4   :  { %1068 = vmatmul.mubr.f32.vlgmr.msra.gmra.mrb[0].mxu1 %v1698_v23 }
 0x1b4   :  { %v1174_v13 = vpop.f32.mrb[0].mxu0 }
 0x1b5   :  { %v740_v16 = vpop.f32.mrb[1].mxu0 }
 0x1b7   :  { %v1069_v20 = vpop.f32.mrb[0].mxu1 }
 0x1b8   :  { %v1367_v32 = vadd.f32 %v1174_v13, %v1069_v20  ;;  %v424_v34 = vpop.f32.mrb[1].mxu1 }
 0x1b9   :  { %v1368_v40 = vadd.f32 %v740_v16, %v424_v34 }
 0x1ba   :  { %751 = vst [vmem:[#allocation5 + $0x8] sm:$0xff] %v1367_v32  ;;  %754 = vmax.xlane.f32.xlu1 %v1367_v32 }
 0x1bb   :  { %750 = vst [vmem:[#allocation5] sm:$0xff] %v1368_v40  ;;  %v784_v60 = vmul.f32 %v1368_v40, %v855_v56 }
 0x1be   :  { %752 = vmax.xlane.f32.xlu1 %v1368_v40 }
 0x1cf   :  { %776 = vperm.xlu1 %1386, %v35_v50  }
 0x247   :  { %v755_v54 = vpop.xlane.xlu1 %754 }
 0x248   :  { %v757_v57 = vsub.f32 %v1367_v32, %v755_v54 }
 0x24a   :  { %v760_v3 = vmul.f32 1.442695, %v757_v57 }
 0x24b   :  { %v753_v8 = vpop.xlane.xlu1 %752 }
 0x24c   :  { %1387 = vpow2.f32 %v760_v3  ;;  %v756_v15 = vsub.f32 %v1368_v40, %v753_v8 }
 0x24e   :  { %v758_v21 = vmul.f32 1.442695, %v756_v15 }
 0x24f   :  { %v777_v41 = vpop.permute.xlu1 %776 }
 0x250   :  { %1389 = vpow2.f32 %v758_v21  ;;  %vm779_vm3 = vcmp.eq.s32.totalorder %v1684_v26, %v777_v41 }
 0x251   :  { %v856_v61 = vsel %vm779_vm3, 1.0, %v1471_v38 }
 0x252   :  { %v785_v1 = vmul.f32 %v1367_v32, %v856_v61 }
 0x256   :  { %v1388_v27 = vpop.eup %1387 }
 0x257   :  { %764 = vadd.xlane.f32.xlu1 %v1388_v27 }
 0x25a   :  { %v1390_v49 = vpop.eup %1389 }
 0x25b   :  { %762 = vadd.xlane.f32.xlu0 %v1390_v49 }
 0x25f   :  { %786 = vadd.xlane.f32.xlu0 %v784_v60 }
 0x263   :  { %788 = vadd.xlane.f32.xlu0 %v785_v1 }
 0x264   :  { %1428 = shalt.err (!%p1425_p12)
}
 0x265   :  { %s1429_s13 = scalar_lea.hbm %s1819_s3, 256 }
 0x266   :  { %p1430_p13 = scmp.ne.s32.totalorder %s1819_s3, %s1429_s13  ;;  %p1433_p0 = scmp.lt.u32.totalorder %s1429_s13, %s1819_s3 }
 0x268   :  { %p1435_p1 = pnand %p1433_p0, %p1430_p13 }
 0x26a   :  { %1438 = shalt.err (!%p1435_p1)
}
 0x26b   :  { %827 = dma.vmem_to_hbm [thread:$0]  %s822_s9, 256, %s1819_s3, [#allocation4], %s1468_s25, %s1468_s25, %s1469_s26   ;;  %vm814_vm4 = vcmask 0  }
 0x26c   :  { %s1474_s3 = smov [#allocation6]  }
 0x26d   :  { %s834_s20 = sshll.u32 %s1474_s3, 4  ;;  %s835_s20 = int_to_ptr.vmem [resolvable:$true] %s834_s20 }
 0x26e   :  { %s1439_s21 = scalar_lea.vmem %s835_s20, 16  ;;  %s1443_s22 = scalar_lea.vmem %s835_s20, 32 }
 0x26f   :  { %p1440_p2 = scmp.ne.s32.totalorder %s835_s20, %s1439_s21  ;;  %p1444_p3 = scmp.lt.s32.totalorder %s835_s20, %s835_s20 }
 0x270   :  { %p1445_p4 = scmp.lt.s32.totalorder %s1443_s22, %s1439_s21 }
 0x272   :  { %p1446_p5 = por %p1445_p4, %p1444_p3 }
 0x274   :  { %p1447_p6 = pnand %p1446_p5, %p1440_p2 }
 0x2e4   :  { %v765_v2 = vpop.xlane.xlu1 %764 }
 0x2e5   :  { %1391 = vlog2.f32 %v765_v2 }
 0x2e8   :  { %v763_v4 = vpop.xlane.xlu0 %762 }
 0x2e9   :  { %1393 = vlog2.f32 %v763_v4 }
 0x2ec   :  { %v787_v53 = vpop.xlane.xlu0 %786 }
 0x2ef   :  { %v1392_v5 = vpop.eup %1391 }
 0x2f0   :  { %v769_v42 = vmul.f32 0.6931472, %v1392_v5  ;;  %v789_v14 = vpop.xlane.xlu0 %788 }
 0x2f2   :  { %v771_v11 = vadd.f32 %v769_v42, %v755_v54 }
 0x2f3   :  { %v1394_v45 = vpop.eup %1393 }
 0x2f4   :  { %v767_v58 = vmul.f32 0.6931472, %v1394_v45  ;;  %v804_v63 = vsub.f32 %v771_v11, %v789_v14 }
 0x2f6   :  { %v770_v12 = vadd.f32 %v767_v58, %v753_v8 }
 0x2f8   :  { %v803_v17 = vsub.f32 %v770_v12, %v787_v53 }
 0x2fa   :  { %v807_v0 = vadd.f32 %v804_v63, %v803_v17 }
 0x2fc   :  { %v808_v18 = vrot.slane %v807_v0, 4 }
 0x2fe   :  { %v809_v19 = vadd.f32 %v808_v18, %v807_v0 }
 0x300   :  { %v810_v22 = vrot.slane %v809_v19, 2 }
 0x302   :  { %v811_v59 = vadd.f32 %v810_v22, %v809_v19 }
 0x304   :  { %v812_v62 = vrot.slane %v811_v59, 1 }
 0x306   :  { %v813_v7 = vadd.f32 %v812_v62, %v811_v59 }
 0x308   :  { %815 = vst.msk [vmem:[#allocation6] sm:$0x1] %vm814_vm4, %v813_v7 }
 0x309   :  { %1450 = shalt.err (!%p1447_p6)
}
 0x30a   :  { %s1451_s25 = scalar_lea.hbm %s1820_s4, 16 }
 0x30b   :  { %p1452_p7 = scmp.ne.s32.totalorder %s1820_s4, %s1451_s25  ;;  %p1455_p8 = scmp.lt.u32.totalorder %s1451_s25, %s1820_s4 }
 0x30d   :  { %p1457_p9 = pnand %p1455_p8, %p1452_p7 }
 0x30f   :  { %1460 = shalt.err (!%p1457_p9)
}
 0x310   :  { %837 = dma.vmem_to_hbm [thread:$0]  %s835_s20, 16, %s1820_s4, [#allocation7]  }
 0x311   :  { %1463 = dma.done.wait [#allocation4], 256  }
 0x312   :  { %1464 = vsyncadd [#allocation4], 4294967040 }
 0x313   :  { %1465 = dma.done.wait [#allocation7], 16  }
 0x314   :  { %1466 = vsyncadd [#allocation7], 4294967280 }
 0x315   :  { %844 = vsyncpa [#allocation3], 1 }
 0x316   :  { %845 = vsyncpa [#allocation4], 1 }
 0x317   :  { %846 = vsyncpa [#allocation7], 1 }

</bundles_post_ra>
